<compile_context>
chip_gen: v5e
topology: v5e:2x2
jax: 0.10.0
libtpu: 0.0.40
codegen_flags: <defaults>
</compile_context>

<pallas_src>
import jax
import jax.numpy as jnp
from jax.experimental import pallas as pl
from jax.experimental.pallas import tpu as pltpu

IN_F = 5        # fc1 input features
HID = 40        # fc1 output / fc2 input features
OUT_F = 3       # fc2 output features
H_PAD = 128     # hidden width padded to one lane-register width
W1_ROWS = 8     # rows 0-4: w1^T, row 5: b1 (+ constant-1 unit), rows 6-7: zero
PACKED_ROWS = W1_ROWS + H_PAD  # 136


def mlp_kernel(x_ref, w_ref, o_ref):
    # x_ref : (tile_b, 5)      w_ref : (136, 128)      o_ref : (tile_b, 128)
    x = x_ref[...]
    w1 = w_ref[0:IN_F, :]                    # (5, 128)   fc1 weights (lane-padded)
    b1 = w_ref[IN_F:IN_F + 1, :]             # (1, 128)   fc1 bias + constant-1 unit
    w2 = w_ref[W1_ROWS:W1_ROWS + H_PAD, :]   # (128, 128) fc2 weights + b2 in row 40

    # fc1 + bias + ReLU.  Lane 40 of h becomes relu(0 + 1) = 1 -> carries b2.
    h = jnp.dot(x, w1, preferred_element_type=jnp.float32) + b1
    h = jnp.maximum(h, 0.0)

    # fc2 (bias already folded via the constant-1 hidden lane). Lanes 3..127 are 0.
    o_ref[...] = jnp.dot(h, w2, preferred_element_type=jnp.float32).astype(o_ref.dtype)


def pack_params(w1, b1, w2, b2):
    """One-time (init-time) packing of PyTorch-layout params into a single
    lane-dense (136, 128) f32 buffer.  NOT on the per-call hot path."""
    w1_blk = jnp.zeros((W1_ROWS, H_PAD), jnp.float32)
    w1_blk = w1_blk.at[0:IN_F, 0:HID].set(jnp.transpose(w1))   # (5, 40)
    w1_blk = w1_blk.at[IN_F, 0:HID].set(b1)                    # b1 row
    w1_blk = w1_blk.at[IN_F, HID].set(1.0)                     # constant-1 hidden unit

    w2_blk = jnp.zeros((H_PAD, H_PAD), jnp.float32)
    w2_blk = w2_blk.at[0:HID, 0:OUT_F].set(jnp.transpose(w2))  # (40, 3)
    w2_blk = w2_blk.at[HID, 0:OUT_F].set(b2)                   # b2 row (hit by const-1 lane)

    return jnp.concatenate([w1_blk, w2_blk], axis=0)           # (136, 128)


def network_forward(x, w_packed):
    """Hot path: a single pallas_call (plus a lane-dense -> 3-wide output slice)."""
    B = x.shape[0]
    block_b = B if B <= 256 else 256        # full-array block for small B, 256-row tiles otherwise
    grid = (pl.cdiv(B, block_b),)

    out = pl.pallas_call(
        mlp_kernel,
        out_shape=jax.ShapeDtypeStruct((B, H_PAD), jnp.float32),
        grid=grid,
        in_specs=[
            pl.BlockSpec((block_b, IN_F), lambda i: (i, 0)),       # x tile, pipelined over batch
            pl.BlockSpec((PACKED_ROWS, H_PAD), lambda i: (0, 0)),  # packed weights, whole array
        ],
        out_specs=pl.BlockSpec((block_b, H_PAD), lambda i: (i, 0)),  # lane-dense output
        compiler_params=pltpu.CompilerParams(
            dimension_semantics=("parallel",)),
    )(x, w_packed)
    return out[:, :OUT_F]


if __name__ == "__main__":
    key = jax.random.PRNGKey(0)
    k_x, k_w1, k_b1, k_w2, k_b2 = jax.random.split(key, 5)

    B = 8  # small batch
    x = jax.random.normal(k_x, (B, IN_F), dtype=jnp.float32)
    w1 = jax.random.normal(k_w1, (HID, IN_F), dtype=jnp.float32) * 0.1   # PyTorch (out, in)
    b1 = jax.random.normal(k_b1, (HID,), dtype=jnp.float32) * 0.1
    w2 = jax.random.normal(k_w2, (OUT_F, HID), dtype=jnp.float32) * 0.1
    b2 = jax.random.normal(k_b2, (OUT_F,), dtype=jnp.float32) * 0.1

    # One-time parameter packing (hoisted out of the per-call path).
    w_packed = jax.block_until_ready(pack_params(w1, b1, w2, b2))

    out = network_forward(x, w_packed)
    out = jax.block_until_ready(out)

    # reference check in plain JAX
    ref = jnp.maximum(x @ w1.T + b1, 0.0) @ w2.T + b2
    assert out.shape == (B, OUT_F)
    assert jnp.allclose(out, ref, atol=1e-5, rtol=1e-5)

    print("KERNEL_OK")
</pallas_src>

<mosaic_0001>
module attributes {stable_mosaic.version = 11 : i64} {
  func.func @mlp_kernel(%arg0: i32, %arg1: memref<8x5xf32, #tpu.memory_space<vmem>>, %arg2: memref<136x128xf32, #tpu.memory_space<vmem>>, %arg3: memref<8x128xf32, #tpu.memory_space<vmem>>) attributes {dimension_semantics = [#tpu.dimension_semantics<parallel>], iteration_bounds = array<i64: 1>, scalar_prefetch = 0 : i64, scratch_operands = 0 : i64, tpu.core_type = #tpu.core_type<tc>, window_params = [{transform_indices = @transform_0, window_bounds = array<i64: 8, 5>}, {pipeline_mode = #tpu.pipeline_mode<synchronous>, transform_indices = @transform_1, window_bounds = array<i64: 136, 128>}, {transform_indices = @transform_2, window_bounds = array<i64: 8, 128>}]} {
    %c0 = arith.constant 0 : index
    %c0_0 = arith.constant 0 : index
    %0 = vector.load %arg1[%c0, %c0_0] : memref<8x5xf32, #tpu.memory_space<vmem>>, vector<8x5xf32>
    %c0_1 = arith.constant 0 : index
    %c0_2 = arith.constant 0 : index
    %1 = vector.load %arg2[%c0_1, %c0_2] : memref<136x128xf32, #tpu.memory_space<vmem>>, vector<5x128xf32>
    %c5 = arith.constant 5 : index
    %c0_3 = arith.constant 0 : index
    %2 = vector.load %arg2[%c5, %c0_3] : memref<136x128xf32, #tpu.memory_space<vmem>>, vector<1x128xf32>
    %c8 = arith.constant 8 : index
    %c0_4 = arith.constant 0 : index
    %3 = vector.load %arg2[%c8, %c0_4] : memref<136x128xf32, #tpu.memory_space<vmem>>, vector<128x128xf32>
    %cst = arith.constant dense<0.000000e+00> : vector<8x128xf32>
    %4 = tpu.matmul %0, %1, %cst {dimension_numbers = #tpu.dot_dimension_numbers<[1], [0], [0], [1], [0, 0, 1, 1], [], []>} : vector<8x5xf32>, vector<5x128xf32>, vector<8x128xf32> -> vector<8x128xf32>
    %5 = vector.broadcast %2 : vector<1x128xf32> to vector<8x128xf32>
    %6 = arith.addf %4, %5 : vector<8x128xf32>
    %cst_5 = arith.constant 0.000000e+00 : f32
    %7 = vector.broadcast %cst_5 : f32 to vector<8x128xf32>
    %8 = arith.maximumf %6, %7 : vector<8x128xf32>
    %cst_6 = arith.constant dense<0.000000e+00> : vector<8x128xf32>
    %9 = tpu.matmul %8, %3, %cst_6 {dimension_numbers = #tpu.dot_dimension_numbers<[1], [0], [0], [1], [0, 0, 1, 1], [], []>} : vector<8x128xf32>, vector<128x128xf32>, vector<8x128xf32> -> vector<8x128xf32>
    %c0_7 = arith.constant 0 : index
    %c0_8 = arith.constant 0 : index
    %10 = vector.load %arg3[%c0_7, %c0_8] : memref<8x128xf32, #tpu.memory_space<vmem>>, vector<8x128xf32>
    tpu.vector_store %arg3[%c0_7, %c0_8], %9 {strides = array<i32>} : memref<8x128xf32, #tpu.memory_space<vmem>>, vector<8x128xf32>,
    return
  }
  func.func @transform_0(%arg0: i32) -> (i32, i32) {
    %c0_i32 = arith.constant 0 : i32
    %c0_i32_0 = arith.constant 0 : i32
    return %arg0, %c0_i32 : i32, i32
  }
  func.func @transform_1(%arg0: i32) -> (i32, i32) {
    %c0_i32 = arith.constant 0 : i32
    %c0_i32_0 = arith.constant 0 : i32
    %c0_i32_1 = arith.constant 0 : i32
    return %c0_i32, %c0_i32_0 : i32, i32
  }
  func.func @transform_2(%arg0: i32) -> (i32, i32) {
    %c0_i32 = arith.constant 0 : i32
    %c0_i32_0 = arith.constant 0 : i32
    return %arg0, %c0_i32 : i32, i32
  }
}

</mosaic_0001>

<bundles_post_ra>
// kernel: tpu_custom_call.1
= control target key start
LH: loop header
LB: loop body
LE: loop exit
PB: predicated region body
PF: predicated region fallthrough
CT: control target
= control target key end

     0   :  { %7 = vsyncpa [#allocation3], 0  ;;  %s245_s0 = inlined_call_operand.hbm [shape: f32[8,5], index: 0, kind: input, shape index: {}]   ;;  %s246_s1 = inlined_call_operand.hbm [shape: f32[136,128], index: 1, kind: input, shape index: {}]   ;;  %s247_s2 = inlined_call_operand.hbm [shape: f32[8,128], index: 2, kind: output, shape index: {}]  }
   0x1   :  { %8 = vsyncpa [#allocation6], 0 }
   0x2   :  { %9 = vsyncpa [#allocation4], 0  ;;  %s15_s11 = sshll.u32 %s245_s0, 4  ;;  %s216_s12 = smov [#allocation2]   ;;  %s16_s11 = int_to_ptr.hbm [resolvable:$true] %s15_s11 }
   0x3   :  { %s17_s13 = sshll.u32 %s216_s12, 4  ;;  %s25_s16 = sshll.u32 %s246_s1, 4  ;;  %s18_s13 = int_to_ptr.vmem [resolvable:$true] %s17_s13  ;;  %s26_s16 = int_to_ptr.hbm [resolvable:$true] %s25_s16 }
   0x4   :  { %20 = dma.hbm_to_vmem [thread:$0]  %s16_s11, 128, %s18_s13, [#allocation3]  }
   0x5   :  { %s217_s17 = smov [#allocation5]   ;;  %s218_s19 = smov 128  }
   0x6   :  { %s27_s18 = sshll.u32 %s217_s17, 4  ;;  %s219_s20 = smov 8   ;;  %s28_s18 = int_to_ptr.vmem [resolvable:$true] %s27_s18 }
   0x7   :  { %33 = dma.hbm_to_vmem [thread:$0]  %s26_s16, 2176, %s28_s18, [#allocation6], %s218_s19, %s218_s19, %s219_s20  }
   0x8   :  { %210 = dma.done.wait [#allocation3], 128  }
   0x9   :  { %211 = vsyncadd [#allocation3], 4294967168 }
   0xa   :  { %212 = dma.done.wait [#allocation6], 2176  }
   0xb   :  { %213 = vsyncadd [#allocation6], 4294965120  ;;  %vm66_vm0 = vcmask 1044480   ;;  %vm62_vm1 = vcmask 39936   ;;  %v43_v0 = vld [vmem:[#allocation5] sm:$0x1f] }
   0xc   :  { %v42_v1 = vld [vmem:[#allocation2] sm:$0xff]  ;;  %v60_v2 = vld [vmem:[#allocation5 + $0x80] sm:$0xff]  ;;  %130 = vmatpush.msk.msra.mxu0 %vm66_vm0, %v43_v0  ;;  %v58_v4 = vld [vmem:[#allocation5 + $0x70] sm:$0xff]  ;;  %s220_s0 = smov [#allocation7]   ;;  %s119_s23 = sshll.u32 %s247_s2, 4  ;;  %s120_s23 = int_to_ptr.hbm [resolvable:$true] %s119_s23 }
   0xd   :  { %91 = vmatpush.msra.mxu1 %v60_v2  ;;  %v59_v3 = vld [vmem:[#allocation5 + $0x78] sm:$0xff]  ;;  %131 = vmatmul.msk.f32.vlgmr.msra.gmra.mxu0 %vm62_vm1, %v42_v1  ;;  %v57_v5 = vld [vmem:[#allocation5 + $0x68] sm:$0xff]  ;;  %v56_v6 = vld [vmem:[#allocation5 + $0x60] sm:$0xff]  ;;  %s117_s1 = sshll.u32 %s220_s0, 4  ;;  %s118_s1 = int_to_ptr.vmem [resolvable:$true] %s117_s1 }
   0xe   :  { %v55_v7 = vld [vmem:[#allocation5 + $0x58] sm:$0xff]  ;;  %v54_v8 = vld [vmem:[#allocation5 + $0x50] sm:$0xff]  ;;  %v53_v9 = vld [vmem:[#allocation5 + $0x48] sm:$0xff] }
   0xf   :  { %92 = vmatpush.msra.mxu1 %v59_v3  ;;  %v52_v10 = vld [vmem:[#allocation5 + $0x40] sm:$0xff]  ;;  %v51_v11 = vld [vmem:[#allocation5 + $0x38] sm:$0xff]  ;;  %v50_v12 = vld [vmem:[#allocation5 + $0x30] sm:$0xff] }
  0x10   :  { %v49_v13 = vld [vmem:[#allocation5 + $0x28] sm:$0xff]  ;;  %v48_v14 = vld [vmem:[#allocation5 + $0x20] sm:$0xff]  ;;  %v47_v15 = vld [vmem:[#allocation5 + $0x18] sm:$0xff] }
  0x11   :  { %93 = vmatpush.msra.mxu1 %v58_v4  ;;  %v46_v16 = vld [vmem:[#allocation5 + $0x10] sm:$0xff]  ;;  %v45_v17 = vld [vmem:[#allocation5 + $0x8] sm:$0xff]  ;;  %v137_v18 = vld [vmem:[#allocation5 + $0x5] ss:$0 sm:$0xff] }
  0x13   :  { %94 = vmatpush.msra.mxu1 %v57_v5 }
  0x15   :  { %95 = vmatpush.msra.mxu1 %v56_v6 }
  0x17   :  { %96 = vmatpush.msra.mxu1 %v55_v7 }
  0x19   :  { %97 = vmatpush.msra.mxu1 %v54_v8 }
  0x1b   :  { %98 = vmatpush.msra.mxu1 %v53_v9 }
  0x1d   :  { %99 = vmatpush.msra.mxu1 %v52_v10 }
  0x1f   :  { %100 = vmatpush.msra.mxu1 %v51_v11 }
  0x21   :  { %101 = vmatpush.msra.mxu1 %v50_v12 }
  0x23   :  { %102 = vmatpush.msra.mxu1 %v49_v13 }
  0x25   :  { %103 = vmatpush.msra.mxu1 %v48_v14 }
  0x27   :  { %104 = vmatpush.msra.mxu1 %v47_v15 }
  0x29   :  { %105 = vmatpush.msra.mxu1 %v46_v16 }
  0x2b   :  { %106 = vmatpush.msra.mxu1 %v45_v17 }
  0x8a   :  { %v87_v19 = vpop.f32.mrf.mxu0 }
  0x8b   :  { %v88_v20 = vadd.f32 %v137_v18, %v87_v19 }
  0x8d   :  { %v90_v21 = vmax.f32 %v88_v20, 0.0 }
  0x8f   :  { %107 = vmatmul.f32.vlgmr.msra.gmra.mxu1 %v90_v21 }
 0x10c   :  { %v108_v22 = vpop.f32.mrf.mxu1 }
 0x10d   :  { %111 = vst [vmem:[#allocation7] sm:$0xff] %v108_v22 }
 0x10e   :  { %122 = dma.vmem_to_hbm [thread:$0]  %s118_s1, 128, %s120_s23, [#allocation4]  }
 0x10f   :  { %214 = dma.done.wait [#allocation4], 128  }
 0x110   :  { %215 = vsyncadd [#allocation4], 4294967168 }
 0x111   :  { %127 = vsyncpa [#allocation3], 1 }
 0x112   :  { %128 = vsyncpa [#allocation6], 1 }
 0x113   :  { %129 = vsyncpa [#allocation4], 1 }

</bundles_post_ra>
